<compile_context>
chip_gen: v7x
topology: tpu7x:2x2x1
jax: 0.10.0
libtpu: 0.0.40
codegen_flags: <defaults>
</compile_context>

<pallas_src>
import functools
import math

import jax
import jax.numpy as jnp
from jax.experimental import pallas as pl
from jax.experimental.pallas import tpu as pltpu

_LANES = 128
_TM_MAX = 2048                          # row-tile cap (v7x VMEM headroom)
_VMEM_BLOCK_BUDGET = 12 * 1024 * 1024   # double-buffered input blocks, all gens
_VMEM_LIMIT = 32 * 1024 * 1024          # <= physical VMEM on v5e/v6e/v7x


def _round_up(a, b):
    return (a + b - 1) // b * b


# --------------------------------------------------------------------------
# Kernels
# --------------------------------------------------------------------------
def _robust_loss_flat_kernel(*refs, epsilon, inv_norm, group, width, has_mask,
                             n_rows, tm, mask_tail):
    """Lane-dense path (original last dim D <= 64).

    Block is (tm, 128) of the flattened data; each logical row occupies
    `group` consecutive lanes.  The constant compaction matrix (128, width)
    sums each logical row's lanes once (width = 128 // group).  Emits a
    (1, 1, width) per-lane partial sum of phi per grid step.
    """
    d1_ref, d2_ref = refs[0], refs[1]
    mask_ref = refs[2] if has_mask else None
    a_ref = refs[2 + int(has_mask)] if group > 1 else None
    out_ref = refs[2 + int(has_mask) + int(group > 1)]

    x = d1_ref[...].astype(jnp.float32) - d2_ref[...].astype(jnp.float32)
    if inv_norm is not None:
        x = x * jnp.float32(inv_norm)
    y = x * x
    if has_mask:
        y = y * mask_ref[...].astype(jnp.float32)

    if group == 1:
        xtx = y                                                   # (tm, 128)
    else:
        # Compaction matmul on the otherwise idle MXU: column c sums the
        # `group` lanes of logical row (sublane * width + c).
        xtx = jnp.dot(y, a_ref[...], preferred_element_type=jnp.float32)

    phi = jnp.sqrt(xtx + jnp.float32(epsilon))                    # (tm, width)

    if mask_tail:
        # Grid over-covers the row dimension; zero phi of garbage tail rows.
        row0 = pl.program_id(0) * tm
        ridx = jax.lax.broadcasted_iota(jnp.int32, (tm, width), 0) + row0
        phi = jnp.where(ridx < n_rows, phi, jnp.float32(0.0))

    out_ref[...] = jnp.sum(phi, axis=0, keepdims=True).reshape(1, 1, width)


def _robust_loss_row_kernel(*refs, epsilon, inv_norm, has_mask,
                            n_rows, tm, mask_tail):
    """Row-tiled path (D > 64).  Block is (tm, D); emits a per-step partial
    sum broadcast across a lane-dense (1, 1, 128) output block."""
    d1_ref, d2_ref = refs[0], refs[1]
    mask_ref = refs[2] if has_mask else None
    out_ref = refs[2 + int(has_mask)]

    x = d1_ref[...].astype(jnp.float32) - d2_ref[...].astype(jnp.float32)
    if inv_norm is not None:
        x = x * jnp.float32(inv_norm)
    y = x * x
    if has_mask:
        y = y * mask_ref[...].astype(jnp.float32)

    xtx = jnp.sum(y, axis=-1, keepdims=True)                      # (tm, 1)
    phi = jnp.sqrt(xtx + jnp.float32(epsilon))                    # (tm, 1)

    if mask_tail:
        row0 = pl.program_id(0) * tm
        ridx = jax.lax.broadcasted_iota(jnp.int32, (tm, 1), 0) + row0
        phi = jnp.where(ridx < n_rows, phi, jnp.float32(0.0))

    partial = jnp.sum(phi)                                        # scalar
    out_ref[...] = jnp.broadcast_to(partial, (1, 1, _LANES)).astype(jnp.float32)


# --------------------------------------------------------------------------
# Wrappers
# --------------------------------------------------------------------------
def _pick_tile(rows, bytes_per_row):
    """Row-tile size from the double-buffered VMEM budget; >= 2 steps when
    the input is big enough so both v7x TensorCores get work."""
    tm = (_VMEM_BLOCK_BUDGET // bytes_per_row) // 32 * 32
    tm = max(32, min(_TM_MAX, tm))
    if rows <= tm:
        tm = _round_up(pl.cdiv(rows, 2), 32) if rows >= 64 else rows
    steps = pl.cdiv(rows, tm)
    return tm, steps


def _robust_loss_small_d(d1, d2, mask, epsilon, inv_norm, M, D):
    has_mask = mask is not None

    group = 1
    while group < D:
        group *= 2                         # power of two, <= 64 here
    width = _LANES // group                # logical rows per 128-lane row
    m_align = _round_up(M, width)          # flattened length % 128 == 0
    pad_m, pad_d = m_align - M, group - D
    rows = (m_align * group) // _LANES

    def prep(a):
        a = a.reshape(M, D)
        if pad_m or pad_d:
            # Only hit for non-lane-aligned shapes / non-pow2 D.  Pads whole
            # zero rows whose phi == sqrt(eps), subtracted analytically below.
            a = jnp.pad(a, ((0, pad_m), (0, pad_d)))
        return a.reshape(rows, _LANES)

    args = [prep(d1), prep(d2)] + ([prep(mask)] if has_mask else [])

    bytes_per_row = 2 * _LANES * sum(a.dtype.itemsize for a in args)
    tm, steps = _pick_tile(rows, bytes_per_row)
    mask_tail = (rows % tm) != 0           # grid over-covers; mask in-kernel

    in_specs = [pl.BlockSpec((tm, _LANES), lambda i: (i, 0))] * len(args)
    if group > 1:
        lane = jnp.arange(_LANES, dtype=jnp.int32)[:, None]
        col = jnp.arange(width, dtype=jnp.int32)[None, :]
        args.append((lane // group == col).astype(jnp.float32))   # (128, width)
        in_specs.append(pl.BlockSpec((_LANES, width), lambda i: (0, 0)))

    kernel = functools.partial(
        _robust_loss_flat_kernel, epsilon=epsilon, inv_norm=inv_norm,
        group=group, width=width, has_mask=has_mask,
        n_rows=rows, tm=tm, mask_tail=mask_tail)

    in_bytes = sum(a.size * a.dtype.itemsize for a in args)
    cost = pl.CostEstimate(
        flops=int((4 + int(has_mask)) * rows * _LANES
                  + 2 * rows * _LANES * width),
        transcendentals=int(rows * width),
        bytes_accessed=int(in_bytes + steps * width * 4))

    partials = pl.pallas_call(
        kernel,
        out_shape=jax.ShapeDtypeStruct((steps, 1, width), jnp.float32),
        grid_spec=pltpu.PrefetchScalarGridSpec(
            num_scalar_prefetch=0, grid=(steps,),
            in_specs=in_specs,
            out_specs=pl.BlockSpec((1, 1, width), lambda i: (i, 0, 0))),
        compiler_params=pltpu.CompilerParams(
            dimension_semantics=("parallel",),
            vmem_limit_bytes=_VMEM_LIMIT),
        cost_estimate=cost,
    )(*args)

    # Every zero-padded logical row contributes exactly sqrt(epsilon).
    return jnp.sum(partials) - jnp.float32(pad_m * math.sqrt(epsilon))


def _robust_loss_large_d(d1, d2, mask, epsilon, inv_norm, M, D):
    has_mask = mask is not None
    args = [d1.reshape(M, D), d2.reshape(M, D)]
    if has_mask:
        args.append(mask.reshape(M, D))

    bytes_per_row = 2 * D * sum(a.dtype.itemsize for a in args)
    tm, steps = _pick_tile(M, bytes_per_row)
    mask_tail = (M % tm) != 0

    kernel = functools.partial(
        _robust_loss_row_kernel, epsilon=epsilon, inv_norm=inv_norm,
        has_mask=has_mask, n_rows=M, tm=tm, mask_tail=mask_tail)

    in_specs = [pl.BlockSpec((tm, D), lambda i: (i, 0))] * len(args)
    out_specs = pl.BlockSpec((1, 1, _LANES), lambda i: (i, 0, 0))

    in_bytes = sum(a.size * a.dtype.itemsize for a in args)
    cost = pl.CostEstimate(
        flops=int((4 + int(has_mask)) * M * D),
        transcendentals=int(M),
        bytes_accessed=int(in_bytes + steps * _LANES * 4))

    partials = pl.pallas_call(
        kernel,
        out_shape=jax.ShapeDtypeStruct((steps, 1, _LANES), jnp.float32),
        grid_spec=pltpu.PrefetchScalarGridSpec(
            num_scalar_prefetch=0, grid=(steps,),
            in_specs=in_specs, out_specs=out_specs),
        compiler_params=pltpu.CompilerParams(
            dimension_semantics=("parallel",),
            vmem_limit_bytes=_VMEM_LIMIT),
        cost_estimate=cost,
    )(*args)

    return jnp.sum(partials[:, 0, 0])


def robust_loss(d1, d2, mask=None, *, epsilon=1e-5, norm=None):
    """Pallas TPU implementation of RobustLoss.forward.  Returns f32 scalar."""
    assert d1.shape == d2.shape
    if mask is not None:
        assert mask.shape == d1.shape
        if mask.dtype == jnp.bool_:
            # Stream 1 byte/elem; converted to f32 on the VPU inside the kernel.
            mask = mask.astype(jnp.int8)

    inv_norm = None if norm is None else 1.0 / float(norm)

    batch = d1.shape[0]
    D = d1.shape[-1]
    M = math.prod(d1.shape[:-1])

    if D <= 64:
        phi_sum = _robust_loss_small_d(d1, d2, mask, epsilon, inv_norm, M, D)
    else:
        phi_sum = _robust_loss_large_d(d1, d2, mask, epsilon, inv_norm, M, D)

    return (phi_sum / batch).astype(jnp.float32)


def robust_loss_ref(d1, d2, mask=None, *, epsilon=1e-5, norm=None):
    if mask is None:
        mask = jnp.ones_like(d1)
    x = d1 - d2
    if norm is not None:
        x = x / norm
    xtx = jnp.sum(x * x * mask, axis=-1)
    phi = jnp.sqrt(xtx + epsilon)
    return jnp.sum(phi) / d1.shape[0]


if __name__ == "__main__":
    key = jax.random.PRNGKey(0)
    ks = jax.random.split(key, 8)

    def check(out, ref, name):
        assert jnp.allclose(out, ref, rtol=1e-4, atol=1e-5), (name, out, ref)

    # 1) displacement matrices (batch=2, nodes=8, disp_dim=2) + float mask
    #    -> lane-dense small-D path, single step.
    B, N, D = 2, 8, 2
    d1 = jax.random.normal(ks[0], (B, N, D), dtype=jnp.float32)
    d2 = jax.random.normal(ks[1], (B, N, D), dtype=jnp.float32)
    m = (jax.random.uniform(ks[2], (B, N, D)) > 0.3).astype(jnp.float32)
    check(jax.block_until_ready(robust_loss(d1, d2, m, epsilon=1e-5)),
          robust_loss_ref(d1, d2, m, epsilon=1e-5), "small-D masked")

    # 2) no mask + norm -> mask-free specialization.
    check(jax.block_until_ready(robust_loss(d1, d2, epsilon=1e-5, norm=2.0)),
          robust_loss_ref(d1, d2, epsilon=1e-5, norm=2.0), "small-D norm")

    # 3) bool mask, multi-step grid with an over-covered tail block
    #    (no wrapper pad; int8 mask streaming; in-kernel tail mask).
    B3, N3, D3 = 2, 2080, 2
    a1 = jax.random.normal(ks[3], (B3, N3, D3), dtype=jnp.float32)
    a2 = jax.random.normal(ks[4], (B3, N3, D3), dtype=jnp.float32)
    bm = jax.random.uniform(ks[5], (B3, N3, D3)) > 0.5
    check(jax.block_until_ready(robust_loss(a1, a2, bm, epsilon=1e-5)),
          robust_loss_ref(a1, a2, bm.astype(jnp.float32), epsilon=1e-5),
          "small-D bool mask")

    # 4) wide last dim -> row-tiled path, single full-extent block.
    B4, N4, D4 = 2, 4, 256
    w1 = jax.random.normal(ks[6], (B4, N4, D4), dtype=jnp.float32)
    w2 = jax.random.normal(ks[7], (B4, N4, D4), dtype=jnp.float32)
    check(jax.block_until_ready(robust_loss(w1, w2, epsilon=1e-5)),
          robust_loss_ref(w1, w2, epsilon=1e-5), "large-D")

    # 5) wide, non-128-multiple D with norm -> row path, 2 steps + tail mask.
    k9, k10 = jax.random.split(ks[0])
    v1 = jax.random.normal(k9, (2, 70, 130), dtype=jnp.float32)
    v2 = jax.random.normal(k10, (2, 70, 130), dtype=jnp.float32)
    check(jax.block_until_ready(robust_loss(v1, v2, epsilon=1e-5, norm=3.0)),
          robust_loss_ref(v1, v2, epsilon=1e-5, norm=3.0), "large-D tail")

    print("KERNEL_OK")
</pallas_src>

<mosaic_0001>
module attributes {stable_mosaic.version = 11 : i64} {
  func.func @_robust_loss_flat_kernel(%arg0: i32, %arg1: memref<1x128xf32, #tpu.memory_space<vmem>>, %arg2: memref<1x128xf32, #tpu.memory_space<vmem>>, %arg3: memref<1x128xf32, #tpu.memory_space<vmem>>, %arg4: memref<128x64xf32, #tpu.memory_space<vmem>>, %arg5: memref<1x1x64xf32, #tpu.memory_space<vmem>>) attributes {dimension_semantics = [#tpu.dimension_semantics<parallel>], iteration_bounds = array<i64: 1>, scalar_prefetch = 0 : i64, scratch_operands = 0 : i64, tpu.core_type = #tpu.core_type<tc>, window_params = [{transform_indices = @transform_0, window_bounds = array<i64: 1, 128>}, {transform_indices = @transform_1, window_bounds = array<i64: 1, 128>}, {transform_indices = @transform_2, window_bounds = array<i64: 1, 128>}, {pipeline_mode = #tpu.pipeline_mode<synchronous>, transform_indices = @transform_3, window_bounds = array<i64: 128, 64>}, {transform_indices = @transform_4, window_bounds = array<i64: 1, 1, 64>}]} {
    %c0 = arith.constant 0 : index
    %c0_0 = arith.constant 0 : index
    %0 = vector.load %arg1[%c0, %c0_0] : memref<1x128xf32, #tpu.memory_space<vmem>>, vector<1x128xf32>
    %c0_1 = arith.constant 0 : index
    %c0_2 = arith.constant 0 : index
    %1 = vector.load %arg2[%c0_1, %c0_2] : memref<1x128xf32, #tpu.memory_space<vmem>>, vector<1x128xf32>
    %2 = arith.subf %0, %1 : vector<1x128xf32>
    %3 = arith.mulf %2, %2 : vector<1x128xf32>
    %c0_3 = arith.constant 0 : index
    %c0_4 = arith.constant 0 : index
    %4 = vector.load %arg3[%c0_3, %c0_4] : memref<1x128xf32, #tpu.memory_space<vmem>>, vector<1x128xf32>
    %5 = arith.mulf %3, %4 : vector<1x128xf32>
    %c0_5 = arith.constant 0 : index
    %c0_6 = arith.constant 0 : index
    %6 = vector.load %arg4[%c0_5, %c0_6] : memref<128x64xf32, #tpu.memory_space<vmem>>, vector<128x64xf32>
    %cst = arith.constant dense<0.000000e+00> : vector<1x64xf32>
    %7 = tpu.matmul %5, %6, %cst {dimension_numbers = #tpu.dot_dimension_numbers<[1], [0], [0], [1], [0, 0, 1, 1], [], []>} : vector<1x128xf32>, vector<128x64xf32>, vector<1x64xf32> -> vector<1x64xf32>
    %cst_7 = arith.constant 9.99999974E-6 : f32
    %8 = vector.broadcast %cst_7 : f32 to vector<1x64xf32>
    %9 = arith.addf %7, %8 : vector<1x64xf32>
    %10 = math.sqrt %9 : vector<1x64xf32>
    %cst_8 = arith.constant dense<0.000000e+00> : vector<64xf32>
    %11 = vector.multi_reduction <add>, %10, %cst_8 [0] : vector<1x64xf32> to vector<64xf32>
    %12 = vector.shape_cast %11 : vector<64xf32> to vector<1x64xf32>
    %13 = vector.shape_cast %12 : vector<1x64xf32> to vector<1x1x64xf32>
    %c0_9 = arith.constant 0 : index
    %c0_10 = arith.constant 0 : index
    %c0_11 = arith.constant 0 : index
    %14 = vector.load %arg5[%c0_9, %c0_10, %c0_11] : memref<1x1x64xf32, #tpu.memory_space<vmem>>, vector<1x1x64xf32>
    tpu.vector_store %arg5[%c0_9, %c0_10, %c0_11], %13 {strides = array<i32>} : memref<1x1x64xf32, #tpu.memory_space<vmem>>, vector<1x1x64xf32>,
    return
  }
  func.func @transform_0(%arg0: i32) -> (i32, i32) {
    %c0_i32 = arith.constant 0 : i32
    %c0_i32_0 = arith.constant 0 : i32
    return %arg0, %c0_i32 : i32, i32
  }
  func.func @transform_1(%arg0: i32) -> (i32, i32) {
    %c0_i32 = arith.constant 0 : i32
    %c0_i32_0 = arith.constant 0 : i32
    return %arg0, %c0_i32 : i32, i32
  }
  func.func @transform_2(%arg0: i32) -> (i32, i32) {
    %c0_i32 = arith.constant 0 : i32
    %c0_i32_0 = arith.constant 0 : i32
    return %arg0, %c0_i32 : i32, i32
  }
  func.func @transform_3(%arg0: i32) -> (i32, i32) {
    %c0_i32 = arith.constant 0 : i32
    %c0_i32_0 = arith.constant 0 : i32
    %c0_i32_1 = arith.constant 0 : i32
    return %c0_i32, %c0_i32_0 : i32, i32
  }
  func.func @transform_4(%arg0: i32) -> (i32, i32, i32) {
    %c0_i32 = arith.constant 0 : i32
    %c0_i32_0 = arith.constant 0 : i32
    %c0_i32_1 = arith.constant 0 : i32
    return %arg0, %c0_i32, %c0_i32_0 : i32, i32, i32
  }
}

</mosaic_0001>

<bundles_post_ra>
// kernel: tpu_custom_call.1
= control target key start
LH: loop header
LB: loop body
LE: loop exit
PB: predicated region body
PF: predicated region fallthrough
CT: control target
= control target key end

     0   :  { %v240_v3 = vmov 0.0|0.0   ;;  %vm241_vm0 = vmmov 0   ;;  %v242_v6 = vmov 0.0   ;;  %s338_s0 = inlined_call_operand.vmem [shape: f32[1,128], index: 0, kind: input, shape index: {}]   ;;  %s339_s1 = inlined_call_operand.vmem [shape: f32[1,128], index: 1, kind: input, shape index: {}]   ;;  %s340_s2 = inlined_call_operand.vmem [shape: f32[1,128], index: 2, kind: input, shape index: {}]   ;;  %s341_s3 = inlined_call_operand.vmem [shape: f32[128,64], index: 3, kind: input, shape index: {}]   ;;  %s342_s4 = inlined_call_operand.hbm [shape: f32[1,1,64], index: 4, kind: output, shape index: {}]  }
   0x1   :  { %v24_v0 = vld [vmem:[%s341_s3] sm:$0xff]  ;;  %v25_v1 = vld [vmem:[%s341_s3 + $0x8] sm:$0xff]  ;;  %v26_v2 = vld [vmem:[%s341_s3 + $0x10] sm:$0xff]  ;;  %186 = vmatprep.subr.bf16.mxu0 %v240_v3  ;;  %183 = vmatprep.mubr.msk.f32.mxu0 %vm241_vm0, %v242_v6 }
   0x2   :  { %v187_v4 = vpack.c.bf16 %v25_v1, %v24_v0  ;;  %v27_v5 = vld [vmem:[%s341_s3 + $0x18] sm:$0xff]  ;;  %v28_v8 = vld [vmem:[%s341_s3 + $0x20] sm:$0xff]  ;;  %v29_v9 = vld [vmem:[%s341_s3 + $0x28] sm:$0xff] }
   0x3   :  { %v190_v7 = vpack.c.bf16 %v27_v5, %v26_v2 }
   0x4   :  { %188 = vmatpush3.bf16.msra.mxu0 %v187_v4 }
   0x5   :  { %189 = vmatprep.subr.bf16.mxu0 %v240_v3 }
   0x6   :  { %9 = vsyncpa [#allocation3], 0  ;;  %v193_v10 = vpack.c.bf16 %v29_v9, %v28_v8  ;;  %v30_v11 = vld [vmem:[%s341_s3 + $0x30] sm:$0xff]  ;;  %v31_v12 = vld [vmem:[%s341_s3 + $0x38] sm:$0xff]  ;;  %s243_s25 = smov [#allocation2]   ;;  %vm118_vm2 = vcmask 516096  }
   0x7   :  { %v196_v13 = vpack.c.bf16 %v31_v12, %v30_v11  ;;  %v32_v14 = vld [vmem:[%s341_s3 + $0x40] sm:$0xff]  ;;  %v33_v15 = vld [vmem:[%s341_s3 + $0x48] sm:$0xff]  ;;  %v34_v17 = vld [vmem:[%s341_s3 + $0x50] sm:$0xff]  ;;  %s126_s26 = sshll.u32 %s243_s25, 4  ;;  %s127_s26 = int_to_ptr.vmem [resolvable:$true] %s126_s26 }
   0x8   :  { %191 = vmatpush3.bf16.msra.mxu0 %v190_v7  ;;  %v199_v16 = vpack.c.bf16 %v33_v15, %v32_v14  ;;  %v35_v18 = vld [vmem:[%s341_s3 + $0x58] sm:$0xff]  ;;  %v18_v20 = vld [vmem:[%s338_s0] sm:$0x1]  ;;  %v37_v23 = vld [vmem:[%s341_s3 + $0x68] sm:$0xff]  ;;  %p221_p1 = scmp.lt.s32.totalorder %s127_s26, %s127_s26 }
   0x9   :  { %192 = vmatprep.subr.bf16.mxu0 %v240_v3  ;;  %v202_v19 = vpack.c.bf16 %v35_v18, %v34_v17  ;;  %v19_v21 = vld [vmem:[%s339_s1] sm:$0x1]  ;;  %v38_v26 = vld [vmem:[%s341_s3 + $0x70] sm:$0xff]  ;;  %v39_v27 = vld [vmem:[%s341_s3 + $0x78] sm:$0xff] }
   0xa   :  { %v36_v22 = vld [vmem:[%s341_s3 + $0x60] sm:$0xff]  ;;  %v20_v24 = vsub.f32 %v18_v20, %v19_v21  ;;  %v208_v29 = vpack.c.bf16 %v39_v27, %v38_v26  ;;  %s220_s3 = scalar_lea.vmem %s127_s26, 32 }
   0xb   :  { %v205_v25 = vpack.c.bf16 %v37_v23, %v36_v22  ;;  %v22_v30 = vld [vmem:[%s340_s2] sm:$0x1]  ;;  %s216_s2 = scalar_lea.vmem %s127_s26, 16 }
   0xc   :  { %194 = vmatpush3.bf16.msra.mxu0 %v193_v10  ;;  %v21_v28 = vmul.f32 %v20_v24, %v20_v24  ;;  %p217_p0 = scmp.ne.s32.totalorder %s127_s26, %s216_s2  ;;  %p222_p2 = scmp.lt.s32.totalorder %s220_s3, %s216_s2 }
   0xd   :  { %195 = vmatprep.subr.bf16.mxu0 %v240_v3 }
   0xe   :  { %v23_v31 = vmul.f32 %v22_v30, %v21_v28  ;;  %p223_p3 = por %p222_p2, %p221_p1 }
  0x10   :  { %197 = vmatpush3.bf16.msra.mxu0 %v196_v13  ;;  %p224_p4 = pnand %p223_p3, %p217_p0 }
  0x11   :  { %198 = vmatprep.subr.bf16.mxu0 %v240_v3 }
  0x14   :  { %200 = vmatpush3.bf16.msra.mxu0 %v199_v16 }
  0x15   :  { %201 = vmatprep.subr.bf16.mxu0 %v240_v3 }
  0x18   :  { %203 = vmatpush3.bf16.msra.mxu0 %v202_v19 }
  0x19   :  { %204 = vmatprep.subr.bf16.mxu0 %v240_v3 }
  0x1c   :  { %206 = vmatpush3.bf16.msra.mxu0 %v205_v25 }
  0x1d   :  { %207 = vmatprep.subr.bf16.mxu0 %v240_v3 }
  0x20   :  { %209 = vmatpush3.bf16.msra.mxu0 %v208_v29 }
  0x23   :  { %184 = vmatmul.mubr.f32.vlgmr.msra.gmra.mrb[0].mxu0 %v23_v31 }
  0xf6   :  { %v106_v32 = vpop.f32.mrb[0].mxu0 }
  0xf7   :  { %v107_v33 = vadd.f32 1e-05, %v106_v32  ;;  %v185_v34 = vpop.f32.mrb[1].mxu0 }
  0xf9   :  { %214 = vrsqrt.f32 %v107_v33  ;;  %vm112_vm1 = vcmp.eq.f32.partialorder %v107_v33, inf  ;;  %v115_v37 = vand.u32 2147483648, %v107_v33  ;;  %vm114_vm3 = vcmp.eq.f32.partialorder %v107_v33, 0.0 }
 0x103   :  { %v215_v35 = vpop.eup %214 }
 0x104   :  { %v111_v36 = vmul.f32 %v215_v35, %v107_v33 }
 0x106   :  { %v113_v38 = vsel %vm112_vm1, %v107_v33, %v111_v36 }
 0x107   :  { %v116_v39 = vsel %vm114_vm3, %v115_v37, %v113_v38 }
 0x108   :  { %119 = vst.msk [vmem:[#allocation2] sm:$0x1] %vm118_vm2, %v116_v39 }
 0x109   :  { %227 = shalt.err (!%p224_p4)
}
 0x10a   :  { %s228_s29 = scalar_lea.hbm %s342_s4, 16 }
 0x10b   :  { %p229_p5 = scmp.ne.s32.totalorder %s342_s4, %s228_s29  ;;  %p232_p6 = scmp.lt.u32.totalorder %s228_s29, %s342_s4 }
 0x10d   :  { %p234_p7 = pnand %p232_p6, %p229_p5 }
 0x10f   :  { %237 = shalt.err (!%p234_p7)
}
 0x110   :  { %129 = dma.vmem_to_hbm [thread:$0]  %s127_s26, 16, %s342_s4, [#allocation3]  }
 0x111   :  { %238 = dma.done.wait [#allocation3], 16  }
 0x112   :  { %239 = vsyncadd [#allocation3], 4294967280 }
 0x113   :  { %133 = vsyncpa [#allocation3], 1 }

</bundles_post_ra>
